<compile_context>
chip_gen: v7x
topology: tpu7x:2x2x1
jax: 0.10.0
libtpu: 0.0.40
codegen_flags: <defaults>
</compile_context>

<pallas_src>
import functools

import jax
import jax.numpy as jnp
from jax import lax
from jax.experimental import pallas as pl
from jax.experimental.pallas import tpu as pltpu

_EPS = 1e-6
_TARGET_BLOCK_VMEM_BYTES = 2 << 20  # ~2 MiB of sublane-padded VMEM per input block


def _round_up(x, m):
    return ((x + m - 1) // m) * m


def _sublane_pack(itemsize):
    # f32 -> 8 sublanes, bf16 -> 16, int8/fp8 -> 32.
    return max(8, 32 // max(int(itemsize), 1))


def _vmem_limit_bytes():
    try:
        info = pltpu.get_tpu_info()
        cap = int(getattr(info, "vmem_capacity_bytes", 64 << 20))
    except Exception:
        cap = 64 << 20  # conservative fallback: v7x per-TensorCore VMEM
    # Leave headroom for compiler-internal scratch: ~48 MiB on v7x (64 MiB
    # physical), ~96-100 MiB on v5e/v6e (128 MiB physical).
    return int(min((cap * 3) // 4, 100 << 20))


def _pick_chunk(d, b, itemsize, target_bytes):
    """Lane-chunk width sized by VMEM bytes (accounting for sublane padding)."""
    rows = _round_up(max(b, 1), _sublane_pack(itemsize))
    lanes = (int(target_bytes) // (rows * int(itemsize))) // 128 * 128
    lanes = max(128, lanes)
    if lanes >= d:
        # Single chunk: use the exact feature dim (block == full array dims,
        # so no padding and no in-kernel mask are ever needed).
        return d
    return lanes


def _diff_loss_kernel(x1_ref, x2_ref, o_ref, g1_acc, g2_acc, *,
                      d1, d2, c1, c2, n1, n2, center_in_loop):
    k = pl.program_id(0)
    n_total = max(n1, n2)

    @pl.when(k == 0)
    def _init():
        g1_acc[...] = jnp.zeros_like(g1_acc)
        g2_acc[...] = jnp.zeros_like(g2_acc)

    def _prep(x):
        if center_in_loop:
            # Two-pass precision fallback: per-chunk column means are
            # column-local, so chunked centering matches full centering.
            x = x.astype(jnp.float32)
            x = x - jnp.mean(x, axis=0, keepdims=True)
        return x

    def _accumulate(acc_ref, x_ref, d, c, n):
        tail = d - (n - 1) * c  # valid lanes in the last chunk (static int)

        def _add(x):
            # Long-K contraction over the feature axis -> (B, B) on the MXU.
            acc_ref[...] += lax.dot_general(
                x, x, dimension_numbers=(((1,), (1,)), ((), ())),
                preferred_element_type=jnp.float32)

        def _full_step():
            _add(_prep(x_ref[...]))

        def _tail_step():
            # Partial edge block: lanes past `tail` hold unspecified values
            # (Pallas edge-block padding) -> zero them before the Gram update.
            x = x_ref[...]
            lane = lax.broadcasted_iota(jnp.int32, x.shape, 1)
            x = jnp.where(lane < tail, x, jnp.zeros_like(x))
            _add(_prep(x))

        if tail == c:
            # Feature dim is an exact multiple of the chunk: no mask anywhere.
            if n == n_total:
                _full_step()
            else:
                pl.when(k < n)(_full_step)
        else:
            # Mask only on the last (cold) step; steady state stays mask-free.
            pl.when(k < n - 1)(_full_step)
            pl.when(k == n - 1)(_tail_step)

    _accumulate(g1_acc, x1_ref, d1, c1, n1)
    _accumulate(g2_acc, x2_ref, d2, c2, n2)

    @pl.when(k == n_total - 1)
    def _finalize():
        bsz = g1_acc.shape[0]
        inv_b = jnp.float32(1.0 / bsz)

        def _centered(g):
            if center_in_loop:
                return g  # already centered chunk-by-chunk
            # Algebraic batch-mean centering from the raw Gram:
            #   C = G - (1/B) (G.1) 1^T - (1/B) 1 (1^T.G) + (1/B^2)(1^T G 1) 11^T
            row = jnp.sum(g, axis=1, keepdims=True)   # (B, 1)
            col = jnp.sum(g, axis=0, keepdims=True)   # (1, B)
            tot = jnp.sum(row)                        # scalar
            return g - inv_b * row - inv_b * col + (inv_b * inv_b) * tot

        c1m = _centered(g1_acc[...])
        c2m = _centered(g2_acc[...])

        eye = (lax.broadcasted_iota(jnp.int32, (bsz, bsz), 0)
               == lax.broadcasted_iota(jnp.int32, (bsz, bsz), 1))
        zero = jnp.zeros_like(c1m)
        # diag(C)[b] == ||x_c[b]||^2; extract as column and row vectors so the
        # outer-product scaling is pure broadcasting.
        n1_col = jnp.sqrt(jnp.sum(jnp.where(eye, c1m, zero), axis=1, keepdims=True))
        n1_row = jnp.sqrt(jnp.sum(jnp.where(eye, c1m, zero), axis=0, keepdims=True))
        n2_col = jnp.sqrt(jnp.sum(jnp.where(eye, c2m, zero), axis=1, keepdims=True))
        n2_row = jnp.sqrt(jnp.sum(jnp.where(eye, c2m, zero), axis=0, keepdims=True))
        # Fold the 1/(D1*D2) mean divisor into the column weights.
        w_col = jnp.float32(1.0 / (d1 * d2)) / ((n1_col + _EPS) * (n2_col + _EPS))
        w_row = 1.0 / ((n1_row + _EPS) * (n2_row + _EPS))
        o_ref[...] = jnp.sum(c1m * c2m * w_col * w_row, keepdims=True)


def diff_loss(input1, input2, *, center_in_loop=False, target_block_bytes=None):
    """Pallas implementation of DiffLoss.forward(input1, input2)."""
    b = input1.shape[0]
    assert input2.shape[0] == b, "batch dims must match"

    # Flatten exactly like torch.Tensor.view(batch, -1); keep the native dtype
    # on the HBM side (the MXU accumulates in f32 regardless).
    x1 = jnp.reshape(input1, (b, -1))
    x2 = jnp.reshape(input2, (b, -1))
    d1, d2 = x1.shape[1], x2.shape[1]

    vmem_limit = _vmem_limit_bytes()
    # 2 inputs x 2 pipeline buffers share the budget; keep ~50% headroom.
    per_block_budget = max(8 * 128 * 4, (vmem_limit // 2) // 4)
    target = min(int(target_block_bytes or _TARGET_BLOCK_VMEM_BYTES),
                 per_block_budget)

    c1 = _pick_chunk(d1, b, x1.dtype.itemsize, target)
    c2 = _pick_chunk(d2, b, x2.dtype.itemsize, target)
    n1 = pl.cdiv(d1, c1)
    n2 = pl.cdiv(d2, c2)
    n_steps = max(n1, n2)

    def _idx_map(n):
        if n == n_steps:
            return lambda k: (0, k)
        # Clamp the smaller input's block index: Pallas skips the repeat DMA
        # for an unchanged block index, so no wasted HBM traffic past step n.
        return lambda k: (0, jnp.minimum(k, n - 1))

    kernel = functools.partial(
        _diff_loss_kernel, d1=d1, d2=d2, c1=c1, c2=c2, n1=n1, n2=n2,
        center_in_loop=center_in_loop)

    out = pl.pallas_call(
        kernel,
        out_shape=jax.ShapeDtypeStruct((1, 1), jnp.float32),
        grid_spec=pltpu.PrefetchScalarGridSpec(
            num_scalar_prefetch=0,
            grid=(n_steps,),
            in_specs=[
                pl.BlockSpec((b, c1), _idx_map(n1)),
                pl.BlockSpec((b, c2), _idx_map(n2)),
            ],
            out_specs=pl.BlockSpec((1, 1), lambda k: (0, 0)),
            scratch_shapes=[
                pltpu.VMEM((b, b), jnp.float32),
                pltpu.VMEM((b, b), jnp.float32),
            ],
        ),
        compiler_params=pltpu.CompilerParams(
            dimension_semantics=("arbitrary",),
            vmem_limit_bytes=vmem_limit,
        ),
    )(x1, x2)
    return out[0, 0]


def _diff_loss_ref(input1, input2):
    """Pure-JAX reference (mirrors the PyTorch forward exactly)."""
    b = input1.shape[0]
    x1 = jnp.reshape(input1, (b, -1)).astype(jnp.float32)
    x2 = jnp.reshape(input2, (b, -1)).astype(jnp.float32)
    x1 = x1 - jnp.mean(x1, axis=0, keepdims=True)
    x2 = x2 - jnp.mean(x2, axis=0, keepdims=True)
    x1 = x1 / (jnp.linalg.norm(x1, axis=1, keepdims=True) + _EPS)
    x2 = x2 / (jnp.linalg.norm(x2, axis=1, keepdims=True) + _EPS)
    return jnp.mean(jnp.square(x1.T @ x2))


if __name__ == "__main__":
    key = jax.random.PRNGKey(0)
    k1, k2, k3 = jax.random.split(key, 3)
    # NCHW feature maps as produced upstream of DiffLoss: batch=2, C=4, H=W=16.
    input1 = jax.random.normal(k1, (2, 4, 16, 16), dtype=jnp.float32)
    input2 = jax.random.normal(k2, (2, 4, 16, 16), dtype=jnp.float32)

    ref = jax.block_until_ready(_diff_loss_ref(input1, input2))

    # Default path: raw-Gram accumulation + algebraic centering, auto chunking
    # (single grid step at this size).
    loss = jax.block_until_ready(diff_loss(input1, input2))
    assert jnp.isfinite(loss), "non-finite loss"
    assert jnp.allclose(loss, ref, rtol=1e-5, atol=1e-7), (loss, ref)

    # Two-pass (center-in-loop) precision fallback path.
    loss_cl = jax.block_until_ready(diff_loss(input1, input2, center_in_loop=True))
    assert jnp.isfinite(loss_cl), "non-finite loss (center_in_loop)"
    assert jnp.allclose(loss_cl, ref, rtol=1e-5, atol=1e-7), (loss_cl, ref)

    # Multi-step grid with asymmetric feature dims and a partial tail chunk:
    # exercises init/accumulate/finalize, the clamped index_map, pl.when gating
    # and the in-kernel tail mask (D1 = 1024, D2 = 400, chunks forced to 128).
    input3 = jax.random.normal(k3, (2, 4, 10, 10), dtype=jnp.float32)
    ref2 = jax.block_until_ready(_diff_loss_ref(input1, input3))
    loss2 = jax.block_until_ready(
        diff_loss(input1, input3, target_block_bytes=4096))
    assert jnp.isfinite(loss2), "non-finite chunked loss"
    assert jnp.allclose(loss2, ref2, rtol=1e-5, atol=1e-7), (loss2, ref2)

    print("KERNEL_OK")
</pallas_src>

<mosaic_0001>
module attributes {stable_mosaic.version = 11 : i64} {
  func.func @_diff_loss_kernel(%arg0: i32, %arg1: memref<2x1024xf32, #tpu.memory_space<vmem>>, %arg2: memref<2x1024xf32, #tpu.memory_space<vmem>>, %arg3: memref<1x1xf32, #tpu.memory_space<vmem>>, %arg4: memref<2x2xf32, #tpu.memory_space<vmem>>, %arg5: memref<2x2xf32, #tpu.memory_space<vmem>>) attributes {dimension_semantics = [#tpu.dimension_semantics<arbitrary>], iteration_bounds = array<i64: 1>, scalar_prefetch = 0 : i64, scratch_operands = 2 : i64, tpu.core_type = #tpu.core_type<tc>, window_params = [{transform_indices = @transform_0, window_bounds = array<i64: 2, 1024>}, {transform_indices = @transform_1, window_bounds = array<i64: 2, 1024>}, {pipeline_mode = #tpu.pipeline_mode<synchronous>, transform_indices = @transform_2, window_bounds = array<i64: 1, 1>}]} {
    %c0_i32 = arith.constant 0 : i32
    %0 = arith.cmpi eq, %arg0, %c0_i32 : i32
    %1 = arith.extui %0 : i1 to i32
    %c0_i32_0 = arith.constant 0 : i32
    %2 = arith.cmpi ne, %1, %c0_i32_0 : i32
    scf.if %2 {
      %cst_15 = arith.constant 0.000000e+00 : f32
      %16 = vector.broadcast %cst_15 : f32 to vector<2x2xf32>
      %c0_16 = arith.constant 0 : index
      %c0_17 = arith.constant 0 : index
      %17 = vector.load %arg4[%c0_16, %c0_17] : memref<2x2xf32, #tpu.memory_space<vmem>>, vector<2x2xf32>
      tpu.vector_store %arg4[%c0_16, %c0_17], %16 {strides = array<i32>} : memref<2x2xf32, #tpu.memory_space<vmem>>, vector<2x2xf32>,
      %cst_18 = arith.constant 0.000000e+00 : f32
      %18 = vector.broadcast %cst_18 : f32 to vector<2x2xf32>
      %c0_19 = arith.constant 0 : index
      %c0_20 = arith.constant 0 : index
      %19 = vector.load %arg5[%c0_19, %c0_20] : memref<2x2xf32, #tpu.memory_space<vmem>>, vector<2x2xf32>
      tpu.vector_store %arg5[%c0_19, %c0_20], %18 {strides = array<i32>} : memref<2x2xf32, #tpu.memory_space<vmem>>, vector<2x2xf32>,
    } else {
    }
    %c0 = arith.constant 0 : index
    %c0_1 = arith.constant 0 : index
    %3 = vector.load %arg1[%c0, %c0_1] : memref<2x1024xf32, #tpu.memory_space<vmem>>, vector<2x1024xf32>
    %c0_2 = arith.constant 0 : index
    %c0_3 = arith.constant 0 : index
    %4 = vector.load %arg4[%c0_2, %c0_3] : memref<2x2xf32, #tpu.memory_space<vmem>>, vector<2x2xf32>
    %cst = arith.constant dense<0.000000e+00> : vector<2x2xf32>
    %5 = tpu.matmul %3, %3, %cst {dimension_numbers = #tpu.dot_dimension_numbers<[1], [1], [0], [0], [0, 0, 1, 0], [], []>} : vector<2x1024xf32>, vector<2x1024xf32>, vector<2x2xf32> -> vector<2x2xf32>
    %6 = arith.addf %4, %5 : vector<2x2xf32>
    %c0_4 = arith.constant 0 : index
    %c0_5 = arith.constant 0 : index
    %7 = vector.load %arg4[%c0_4, %c0_5] : memref<2x2xf32, #tpu.memory_space<vmem>>, vector<2x2xf32>
    tpu.vector_store %arg4[%c0_4, %c0_5], %6 {strides = array<i32>} : memref<2x2xf32, #tpu.memory_space<vmem>>, vector<2x2xf32>,
    %c0_6 = arith.constant 0 : index
    %c0_7 = arith.constant 0 : index
    %8 = vector.load %arg2[%c0_6, %c0_7] : memref<2x1024xf32, #tpu.memory_space<vmem>>, vector<2x1024xf32>
    %c0_8 = arith.constant 0 : index
    %c0_9 = arith.constant 0 : index
    %9 = vector.load %arg5[%c0_8, %c0_9] : memref<2x2xf32, #tpu.memory_space<vmem>>, vector<2x2xf32>
    %cst_10 = arith.constant dense<0.000000e+00> : vector<2x2xf32>
    %10 = tpu.matmul %8, %8, %cst_10 {dimension_numbers = #tpu.dot_dimension_numbers<[1], [1], [0], [0], [0, 0, 1, 0], [], []>} : vector<2x1024xf32>, vector<2x1024xf32>, vector<2x2xf32> -> vector<2x2xf32>
    %11 = arith.addf %9, %10 : vector<2x2xf32>
    %c0_11 = arith.constant 0 : index
    %c0_12 = arith.constant 0 : index
    %12 = vector.load %arg5[%c0_11, %c0_12] : memref<2x2xf32, #tpu.memory_space<vmem>>, vector<2x2xf32>
    tpu.vector_store %arg5[%c0_11, %c0_12], %11 {strides = array<i32>} : memref<2x2xf32, #tpu.memory_space<vmem>>, vector<2x2xf32>,
    %c0_i32_13 = arith.constant 0 : i32
    %13 = arith.cmpi eq, %arg0, %c0_i32_13 : i32
    %14 = arith.extui %13 : i1 to i32
    %c0_i32_14 = arith.constant 0 : i32
    %15 = arith.cmpi ne, %14, %c0_i32_14 : i32
    scf.if %15 {
      %c0_15 = arith.constant 0 : index
      %c0_16 = arith.constant 0 : index
      %16 = vector.load %arg4[%c0_15, %c0_16] : memref<2x2xf32, #tpu.memory_space<vmem>>, vector<2x2xf32>
      %cst_17 = arith.constant dense<0.000000e+00> : vector<2xf32>
      %17 = vector.multi_reduction <add>, %16, %cst_17 [1] : vector<2x2xf32> to vector<2xf32>
      %18 = vector.shape_cast %17 : vector<2xf32> to vector<2x1xf32>
      %cst_18 = arith.constant dense<0.000000e+00> : vector<2xf32>
      %19 = vector.multi_reduction <add>, %16, %cst_18 [0] : vector<2x2xf32> to vector<2xf32>
      %20 = vector.shape_cast %19 : vector<2xf32> to vector<1x2xf32>
      %21 = vector.shape_cast %18 : vector<2x1xf32> to vector<1x2x1xf32>
      %cst_19 = arith.constant dense<0.000000e+00> : vector<1xf32>
      %22 = vector.multi_reduction <add>, %21, %cst_19 [1, 2] : vector<1x2x1xf32> to vector<1xf32>
      %23 = vector.shape_cast %22 : vector<1xf32> to vector<1x1x1xf32>
      %24 = vector.extract %23[0, 0, 0] : f32 from vector<1x1x1xf32>
      %cst_20 = arith.constant 5.000000e-01 : f32
      %25 = vector.broadcast %cst_20 : f32 to vector<2x1xf32>
      %26 = arith.mulf %25, %18 : vector<2x1xf32>
      %27 = vector.broadcast %26 : vector<2x1xf32> to vector<2x2xf32>
      %28 = arith.subf %16, %27 : vector<2x2xf32>
      %cst_21 = arith.constant 5.000000e-01 : f32
      %29 = vector.broadcast %cst_21 : f32 to vector<1x2xf32>
      %30 = arith.mulf %29, %20 : vector<1x2xf32>
      %31 = vector.broadcast %30 : vector<1x2xf32> to vector<2x2xf32>
      %32 = arith.subf %28, %31 : vector<2x2xf32>
      %cst_22 = arith.constant 5.000000e-01 : f32
      %cst_23 = arith.constant 5.000000e-01 : f32
      %33 = arith.mulf %cst_22, %cst_23 : f32
      %34 = arith.mulf %33, %24 : f32
      %35 = vector.broadcast %34 : f32 to vector<2x2xf32>
      %36 = arith.addf %32, %35 : vector<2x2xf32>
      %c0_24 = arith.constant 0 : index
      %c0_25 = arith.constant 0 : index
      %37 = vector.load %arg5[%c0_24, %c0_25] : memref<2x2xf32, #tpu.memory_space<vmem>>, vector<2x2xf32>
      %cst_26 = arith.constant dense<0.000000e+00> : vector<2xf32>
      %38 = vector.multi_reduction <add>, %37, %cst_26 [1] : vector<2x2xf32> to vector<2xf32>
      %39 = vector.shape_cast %38 : vector<2xf32> to vector<2x1xf32>
      %cst_27 = arith.constant dense<0.000000e+00> : vector<2xf32>
      %40 = vector.multi_reduction <add>, %37, %cst_27 [0] : vector<2x2xf32> to vector<2xf32>
      %41 = vector.shape_cast %40 : vector<2xf32> to vector<1x2xf32>
      %42 = vector.shape_cast %39 : vector<2x1xf32> to vector<1x2x1xf32>
      %cst_28 = arith.constant dense<0.000000e+00> : vector<1xf32>
      %43 = vector.multi_reduction <add>, %42, %cst_28 [1, 2] : vector<1x2x1xf32> to vector<1xf32>
      %44 = vector.shape_cast %43 : vector<1xf32> to vector<1x1x1xf32>
      %45 = vector.extract %44[0, 0, 0] : f32 from vector<1x1x1xf32>
      %cst_29 = arith.constant 5.000000e-01 : f32
      %46 = vector.broadcast %cst_29 : f32 to vector<2x1xf32>
      %47 = arith.mulf %46, %39 : vector<2x1xf32>
      %48 = vector.broadcast %47 : vector<2x1xf32> to vector<2x2xf32>
      %49 = arith.subf %37, %48 : vector<2x2xf32>
      %cst_30 = arith.constant 5.000000e-01 : f32
      %50 = vector.broadcast %cst_30 : f32 to vector<1x2xf32>
      %51 = arith.mulf %50, %41 : vector<1x2xf32>
      %52 = vector.broadcast %51 : vector<1x2xf32> to vector<2x2xf32>
      %53 = arith.subf %49, %52 : vector<2x2xf32>
      %cst_31 = arith.constant 5.000000e-01 : f32
      %cst_32 = arith.constant 5.000000e-01 : f32
      %54 = arith.mulf %cst_31, %cst_32 : f32
      %55 = arith.mulf %54, %45 : f32
      %56 = vector.broadcast %55 : f32 to vector<2x2xf32>
      %57 = arith.addf %53, %56 : vector<2x2xf32>
      %58 = tpu.iota {dimensions = array<i32: 0>} : vector<2x2xi32>
      %59 = tpu.iota {dimensions = array<i32: 1>} : vector<2x2xi32>
      %60 = arith.cmpi eq, %58, %59 : vector<2x2xi32>
      %cst_33 = arith.constant 0.000000e+00 : f32
      %61 = vector.broadcast %cst_33 : f32 to vector<2x2xf32>
      %62 = arith.select %60, %36, %61 : vector<2x2xi1>, vector<2x2xf32>
      %cst_34 = arith.constant dense<0.000000e+00> : vector<2xf32>
      %63 = vector.multi_reduction <add>, %62, %cst_34 [1] : vector<2x2xf32> to vector<2xf32>
      %64 = vector.shape_cast %63 : vector<2xf32> to vector<2x1xf32>
      %65 = math.sqrt %64 : vector<2x1xf32>
      %66 = arith.select %60, %36, %61 : vector<2x2xi1>, vector<2x2xf32>
      %cst_35 = arith.constant dense<0.000000e+00> : vector<2xf32>
      %67 = vector.multi_reduction <add>, %66, %cst_35 [0] : vector<2x2xf32> to vector<2xf32>
      %68 = vector.shape_cast %67 : vector<2xf32> to vector<1x2xf32>
      %69 = math.sqrt %68 : vector<1x2xf32>
      %70 = arith.select %60, %57, %61 : vector<2x2xi1>, vector<2x2xf32>
      %cst_36 = arith.constant dense<0.000000e+00> : vector<2xf32>
      %71 = vector.multi_reduction <add>, %70, %cst_36 [1] : vector<2x2xf32> to vector<2xf32>
      %72 = vector.shape_cast %71 : vector<2xf32> to vector<2x1xf32>
      %73 = math.sqrt %72 : vector<2x1xf32>
      %74 = arith.select %60, %57, %61 : vector<2x2xi1>, vector<2x2xf32>
      %cst_37 = arith.constant dense<0.000000e+00> : vector<2xf32>
      %75 = vector.multi_reduction <add>, %74, %cst_37 [0] : vector<2x2xf32> to vector<2xf32>
      %76 = vector.shape_cast %75 : vector<2xf32> to vector<1x2xf32>
      %77 = math.sqrt %76 : vector<1x2xf32>
      %cst_38 = arith.constant 9.99999997E-7 : f32
      %78 = vector.broadcast %cst_38 : f32 to vector<2x1xf32>
      %79 = arith.addf %65, %78 : vector<2x1xf32>
      %cst_39 = arith.constant 9.99999997E-7 : f32
      %80 = vector.broadcast %cst_39 : f32 to vector<2x1xf32>
      %81 = arith.addf %73, %80 : vector<2x1xf32>
      %82 = arith.mulf %79, %81 : vector<2x1xf32>
      %cst_40 = arith.constant 9.53674316E-7 : f32
      %83 = vector.broadcast %cst_40 : f32 to vector<2x1xf32>
      %84 = arith.divf %83, %82 : vector<2x1xf32>
      %cst_41 = arith.constant 9.99999997E-7 : f32
      %85 = vector.broadcast %cst_41 : f32 to vector<1x2xf32>
      %86 = arith.addf %69, %85 : vector<1x2xf32>
      %cst_42 = arith.constant 9.99999997E-7 : f32
      %87 = vector.broadcast %cst_42 : f32 to vector<1x2xf32>
      %88 = arith.addf %77, %87 : vector<1x2xf32>
      %89 = arith.mulf %86, %88 : vector<1x2xf32>
      %cst_43 = arith.constant 1.000000e+00 : f32
      %90 = vector.broadcast %cst_43 : f32 to vector<1x2xf32>
      %91 = arith.divf %90, %89 : vector<1x2xf32>
      %92 = arith.mulf %36, %57 : vector<2x2xf32>
      %93 = vector.broadcast %84 : vector<2x1xf32> to vector<2x2xf32>
      %94 = arith.mulf %92, %93 : vector<2x2xf32>
      %95 = vector.broadcast %91 : vector<1x2xf32> to vector<2x2xf32>
      %96 = arith.mulf %94, %95 : vector<2x2xf32>
      %97 = vector.shape_cast %96 : vector<2x2xf32> to vector<1x2x2xf32>
      %cst_44 = arith.constant dense<0.000000e+00> : vector<1xf32>
      %98 = vector.multi_reduction <add>, %97, %cst_44 [1, 2] : vector<1x2x2xf32> to vector<1xf32>
      %99 = vector.shape_cast %98 : vector<1xf32> to vector<1x1x1xf32>
      %100 = vector.extract %99[0, 0, 0] : f32 from vector<1x1x1xf32>
      %101 = vector.broadcast %100 : f32 to vector<1x1xf32>
      %c0_45 = arith.constant 0 : index
      %c0_46 = arith.constant 0 : index
      %102 = vector.load %arg3[%c0_45, %c0_46] : memref<1x1xf32, #tpu.memory_space<vmem>>, vector<1x1xf32>
      tpu.vector_store %arg3[%c0_45, %c0_46], %101 {strides = array<i32>} : memref<1x1xf32, #tpu.memory_space<vmem>>, vector<1x1xf32>,
    } else {
    }
    return
  }
  func.func @transform_0(%arg0: i32) -> (i32, i32) {
    %c0_i32 = arith.constant 0 : i32
    %c0_i32_0 = arith.constant 0 : i32
    return %c0_i32, %arg0 : i32, i32
  }
  func.func @transform_1(%arg0: i32) -> (i32, i32) {
    %c0_i32 = arith.constant 0 : i32
    %c0_i32_0 = arith.constant 0 : i32
    return %c0_i32, %arg0 : i32, i32
  }
  func.func @transform_2(%arg0: i32) -> (i32, i32) {
    %c0_i32 = arith.constant 0 : i32
    %c0_i32_0 = arith.constant 0 : i32
    %c0_i32_1 = arith.constant 0 : i32
    return %c0_i32, %c0_i32_0 : i32, i32
  }
}

</mosaic_0001>

<bundles_post_ra>
// kernel: tpu_custom_call.1
= control target key start
LH: loop header
LB: loop body
LE: loop exit
PB: predicated region body
PF: predicated region fallthrough
CT: control target
= control target key end

     0   :  { %7 = vsyncpa [#allocation5], 0  ;;  %s1029_s0 = inlined_call_operand.hbm [shape: f32[2,1024], index: 0, kind: input, shape index: {}]   ;;  %s1030_s1 = inlined_call_operand.hbm [shape: f32[2,1024], index: 1, kind: input, shape index: {}]   ;;  %s1031_s2 = inlined_call_operand.hbm [shape: f32[1,1], index: 2, kind: output, shape index: {}]  }
   0x1   :  { %8 = vsyncpa [#allocation8], 0 }
   0x2   :  { %9 = vsyncpa [#allocation6], 0  ;;  %s954_s9 = smov [#allocation4]   ;;  %s955_s11 = smov [#allocation7]  }
   0x3   :  { %s16_s10 = sshll.u32 %s954_s9, 4  ;;  %s26_s12 = sshll.u32 %s955_s11, 4  ;;  %s17_s10 = int_to_ptr.vmem [resolvable:$true] %s16_s10  ;;  %s27_s12 = int_to_ptr.vmem [resolvable:$true] %s26_s12 }
   0x4   :  { %s882_s15 = scalar_lea.hbm %s1029_s0, 256 }
   0x5   :  { %p883_p0 = scmp.ne.s32.totalorder %s1029_s0, %s882_s15  ;;  %p886_p1 = scmp.lt.u32.totalorder %s882_s15, %s1029_s0 }
   0x7   :  { %p888_p2 = pnand %p886_p1, %p883_p0 }
   0x9   :  { %891 = shalt.err (!%p888_p2)
}
   0xa   :  { %s892_s20 = scalar_lea.vmem %s17_s10, 256  ;;  %p897_p4 = scmp.lt.s32.totalorder %s17_s10, %s17_s10 }
   0xb   :  { %p893_p3 = scmp.ne.s32.totalorder %s17_s10, %s892_s20  ;;  %p898_p5 = scmp.lt.s32.totalorder %s892_s20, %s892_s20 }
   0xd   :  { %p899_p6 = por %p898_p5, %p897_p4 }
   0xf   :  { %p900_p7 = pnand %p899_p6, %p893_p3 }
  0x11   :  { %903 = shalt.err (!%p900_p7)
}
  0x12   :  { %19 = dma.hbm_to_vmem [thread:$0]  %s1029_s0, 256, %s17_s10, [#allocation5]  }
  0x13   :  { %s904_s25 = scalar_lea.hbm %s1030_s1, 256 }
  0x14   :  { %p905_p8 = scmp.ne.s32.totalorder %s1030_s1, %s904_s25  ;;  %p908_p9 = scmp.lt.u32.totalorder %s904_s25, %s1030_s1 }
  0x16   :  { %p910_p10 = pnand %p908_p9, %p905_p8 }
  0x18   :  { %913 = shalt.err (!%p910_p10)
}
  0x19   :  { %s914_s30 = scalar_lea.vmem %s27_s12, 256  ;;  %p919_p12 = scmp.lt.s32.totalorder %s27_s12, %s27_s12 }
  0x1a   :  { %p915_p11 = scmp.ne.s32.totalorder %s27_s12, %s914_s30  ;;  %p920_p13 = scmp.lt.s32.totalorder %s914_s30, %s914_s30 }
  0x1c   :  { %p921_p0 = por %p920_p13, %p919_p12 }
  0x1e   :  { %p922_p1 = pnand %p921_p0, %p915_p11 }
  0x20   :  { %925 = shalt.err (!%p922_p1)
}
  0x21   :  { %29 = dma.hbm_to_vmem [thread:$0]  %s1030_s1, 256, %s27_s12, [#allocation8]  }
  0x22   :  { %948 = dma.done.wait [#allocation5], 256  }
  0x23   :  { %949 = vsyncadd [#allocation5], 4294967040 }
  0x24   :  { %950 = dma.done.wait [#allocation8], 256  }
  0x25   :  { %951 = vsyncadd [#allocation8], 4294967040  ;;  %v52_v0 = vlaneseq  ;;  %v956_v1 = vmov 1983009808   ;;  %v43_v6 = vld [vmem:[#allocation4] sm:$0xff]  ;;  %v44_v7 = vld [vmem:[#allocation4 + $0x8] sm:$0xff] }
  0x26   :  { %v50_v2 = vunpack.c.l.s4 %v956_v1  ;;  %v373_v8 = vld [vmem:[#allocation7] sm:$0xff]  ;;  %v48_v10 = vcombine.high %v43_v6, %v43_v6  ;;  %v65_v12 = vcombine.high %v44_v7, %v44_v7  ;;  %v374_v13 = vld [vmem:[#allocation7 + $0x8] sm:$0xff]  ;;  %vm40_vm0 = vcmask 9216   ;;  %s958_s7 = smov [#allocation9]  }
  0x27   :  { %v999_v3 = vshrl.u32 %v52_v0, 7  ;;  %v378_v15 = vcombine.high %v373_v8, %v373_v8  ;;  %v395_v20 = vcombine.high %v374_v13, %v374_v13  ;;  %v957_v30 = vmov 0.0   ;;  %s845_s8 = sshll.u32 %s958_s7, 4  ;;  %s846_s8 = int_to_ptr.vmem [resolvable:$true] %s845_s8 }
  0x28   :  { %v51_v4 = vunpack.c.0.s8 %v50_v2  ;;  %41 = vst.msk [vmem:[#allocation2] sm:$0x3] %vm40_vm0, %v957_v30  ;;  %42 = vst.msk [vmem:[#allocation3] sm:$0x3] %vm40_vm0, %v957_v30  ;;  %vm715_vm1 = vcmask 1024   ;;  %vm837_vm11 = vcmask 0   ;;  %p931_p3 = scmp.lt.s32.totalorder %s846_s8, %s846_s8 }
  0x29   :  { %s926_s10 = scalar_lea.vmem %s846_s8, 16  ;;  %s930_s11 = scalar_lea.vmem %s846_s8, 32 }
  0x2a   :  { %v54_v5 = vsub.s32 %v51_v4, %v999_v3  ;;  %p927_p2 = scmp.ne.s32.totalorder %s846_s8, %s926_s10  ;;  %p932_p4 = scmp.lt.s32.totalorder %s930_s11, %s926_s10 }
  0x2c   :  { %v55_v9 = vrot.slane %v43_v6, %v54_v5  ;;  %v72_v11 = vrot.slane %v44_v7, %v54_v5  ;;  %v385_v14 = vrot.slane %v373_v8, %v54_v5  ;;  %v62_v17 = vrot.slane %v48_v10, %v54_v5  ;;  %p933_p5 = por %p932_p4, %p931_p3 }
  0x2d   :  { %v79_v19 = vrot.slane %v65_v12, %v54_v5  ;;  %v392_v23 = vrot.slane %v378_v15, %v54_v5  ;;  %v402_v25 = vrot.slane %v374_v13, %v54_v5  ;;  %v409_v27 = vrot.slane %v395_v20, %v54_v5 }
  0x2e   :  { %v63_v16 = vcombine.high %v55_v9, %v55_v9  ;;  %v80_v18 = vcombine.high %v72_v11, %v72_v11  ;;  %v64_v21 = vcombine.high %v62_v17, %v62_v17  ;;  %v393_v24 = vcombine.high %v385_v14, %v385_v14  ;;  %p934_p6 = pnand %p933_p5, %p927_p2 }
  0x2f   :  { %v81_v22 = vcombine.high %v79_v19, %v79_v19  ;;  %v394_v26 = vcombine.high %v392_v23, %v392_v23  ;;  %v410_v28 = vcombine.high %v402_v25, %v402_v25  ;;  %v411_v29 = vcombine.high %v409_v27, %v409_v27  ;;  %v45_v39 = vld [vmem:[#allocation2] sm:$0x3]  ;;  %v375_v52 = vld [vmem:[#allocation3] sm:$0x3] }
  0x30   :  { %90 = vmatprep.subr.mxu0 %v63_v16  ;;  %154 = vmatprep.mubr.f32.mxu0 %v63_v16 }
  0x31   :  { %91 = vmatpush1.xpose.msra.mxu0 %v55_v9  ;;  %160 = vmatprep.subr.mxu1 %v64_v21 }
  0x32   :  { %230 = vmatprep.subr.mxu0 %v80_v18  ;;  %161 = vmatpush1.xpose.msra.mxu1 %v62_v17 }
  0x33   :  { %224 = vmatprep.mubr.f32.mxu1 %v64_v21  ;;  %300 = vmatprep.subr.mxu1 %v81_v22 }
  0x34   :  { %155 = vmatmul.mubr.f32.vlgmr.msra.gmra.mrb[0].mxu0 %v55_v9 }
  0x35   :  { %231 = vmatpush1.xpose.msra.mxu0 %v72_v11  ;;  %294 = vmatprep.mubr.f32.mxu0 %v80_v18 }
  0x36   :  { %225 = vmatmul.mubr.f32.vlgmr.msra.gmra.mrb[0].mxu1 %v62_v17  ;;  %420 = vmatprep.subr.mxu0 %v393_v24 }
  0x37   :  { %301 = vmatpush1.xpose.msra.mxu1 %v79_v19  ;;  %364 = vmatprep.mubr.f32.mxu1 %v81_v22 }
  0x38   :  { %295 = vmatmul.mubr.f32.vlgmr.msra.gmra.mrb[2].mxu0 %v72_v11  ;;  %490 = vmatprep.subr.mxu1 %v394_v26 }
  0x39   :  { %421 = vmatpush1.xpose.msra.mxu0 %v385_v14  ;;  %484 = vmatprep.mubr.f32.mxu0 %v393_v24 }
  0x3a   :  { %365 = vmatmul.mubr.f32.vlgmr.msra.gmra.mrb[2].mxu1 %v79_v19  ;;  %560 = vmatprep.subr.mxu0 %v410_v28 }
  0x3b   :  { %491 = vmatpush1.xpose.msra.mxu1 %v392_v23  ;;  %554 = vmatprep.mubr.f32.mxu1 %v394_v26 }
  0x3c   :  { %485 = vmatmul.mubr.f32.vlgmr.msra.gmra.mrb[4].mxu0 %v385_v14  ;;  %630 = vmatprep.subr.mxu1 %v411_v29 }
  0x3d   :  { %561 = vmatpush1.xpose.msra.mxu0 %v402_v25  ;;  %624 = vmatprep.mubr.f32.mxu0 %v410_v28 }
  0x3e   :  { %555 = vmatmul.mubr.f32.vlgmr.msra.gmra.mrb[4].mxu1 %v392_v23 }
  0x3f   :  { %631 = vmatpush1.xpose.msra.mxu1 %v409_v27  ;;  %694 = vmatprep.mubr.f32.mxu1 %v411_v29 }
  0x40   :  { %625 = vmatmul.mubr.f32.vlgmr.msra.gmra.mrb[6].mxu0 %v402_v25 }
  0x42   :  { %695 = vmatmul.mubr.f32.vlgmr.msra.gmra.mrb[6].mxu1 %v409_v27 }
 0x107   :  { %v156_v31 = vpop.f32.mrb[0].mxu0 }
 0x108   :  { %v158_v32 = vpop.f32.mrb[1].mxu0 }
 0x109   :  { %v226_v33 = vpop.f32.mrb[0].mxu1 }
 0x10a   :  { %v227_v34 = vadd.f32 %v226_v33, %v156_v31  ;;  %v228_v35 = vpop.f32.mrb[1].mxu1  ;;  %v763_v31 = vand.u32 127, %v52_v0 }
 0x10b   :  { %v296_v36 = vpop.f32.mrb[2].mxu0 }
 0x10c   :  { %v297_v37 = vadd.f32 %v296_v36, %v227_v34  ;;  %v298_v38 = vpop.f32.mrb[3].mxu0  ;;  %vm764_vm2 = vcmp.eq.s32.totalorder %v999_v3, %v763_v31 }
 0x10d   :  { %v366_v40 = vpop.f32.mrb[2].mxu1 }
 0x10e   :  { %v367_v41 = vadd.f32 %v366_v40, %v297_v37  ;;  %v368_v42 = vpop.f32.mrb[3].mxu1 }
 0x10f   :  { %v486_v43 = vpop.f32.mrb[4].mxu0 }
 0x110   :  { %v370_v44 = vadd.f32 %v367_v41, %v45_v39  ;;  %v488_v45 = vpop.f32.mrb[5].mxu0 }
 0x111   :  { %v556_v46 = vpop.f32.mrb[4].mxu1 }
 0x112   :  { %372 = vst.msk [vmem:[#allocation2] sm:$0x3] %vm40_vm0, %v370_v44  ;;  %v557_v47 = vadd.f32 %v556_v46, %v486_v43  ;;  %v558_v48 = vpop.f32.mrb[5].mxu1 }
 0x113   :  { %v626_v49 = vpop.f32.mrb[6].mxu0 }
 0x114   :  { %v627_v50 = vadd.f32 %v626_v49, %v557_v47  ;;  %v628_v51 = vpop.f32.mrb[7].mxu0 }
 0x115   :  { %v696_v53 = vpop.f32.mrb[6].mxu1 }
 0x116   :  { %v697_v54 = vadd.f32 %v696_v53, %v627_v50  ;;  %v698_v55 = vpop.f32.mrb[7].mxu1 }
 0x118   :  { %v700_v56 = vadd.f32 %v697_v54, %v375_v52 }
 0x119   :  { %v705_v57 = vld [vmem:[#allocation2] sm:$0x3] }
 0x11a   :  { %701 = vst.msk [vmem:[#allocation3] sm:$0x3] %vm40_vm0, %v700_v56  ;;  %v706_v58 = vsel %vm40_vm0, %v705_v57, 0.0 }
 0x11b   :  { %707 = vadd.xlane.f32.xlu0 %v706_v58  ;;  %v709_v61 = vrot.slane %v706_v58, 4 }
 0x11d   :  { %v710_v62 = vadd.f32 %v709_v61, %v706_v58 }
 0x11f   :  { %v711_v63 = vrot.slane %v710_v62, 2 }
 0x121   :  { %v733_v59 = vld [vmem:[#allocation3] sm:$0x3]  ;;  %v712_v1 = vadd.f32 %v711_v63, %v710_v62 }
 0x122   :  { %v734_v60 = vsel %vm40_vm0, %v733_v59, 0.0 }
 0x123   :  { %735 = vadd.xlane.f32.xlu0 %v734_v60  ;;  %v713_v2 = vrot.slane %v712_v1, 1  ;;  %v737_v27 = vrot.slane %v734_v60, 4 }
 0x125   :  { %v714_v4 = vadd.f32 %v713_v2, %v712_v1  ;;  %v738_v28 = vadd.f32 %v737_v27, %v734_v60 }
 0x127   :  { %v728_v9 = vmul.f32 0.5, %v714_v4  ;;  %v739_v29 = vrot.slane %v738_v28, 2 }
 0x129   :  { %v740_v30 = vadd.f32 %v739_v29, %v738_v28 }
 0x12b   :  { %v741_v32 = vrot.slane %v740_v30, 1 }
 0x12d   :  { %v742_v36 = vadd.f32 %v741_v32, %v740_v30 }
 0x12f   :  { %v755_v40 = vmul.f32 0.5, %v742_v36 }
 0x1a8   :  { %v708_v5 = vpop.xlane.xlu0 %707 }
 0x1a9   :  { %v726_v6 = vmul.f32 0.5, %v708_v5  ;;  %v716_v7 = vsel %vm715_vm1, %v708_v5, 0.0 }
 0x1aa   :  { %717 = vadd.xlane.f32.xlu1 %v716_v7 }
 0x1ab   :  { %v727_v8 = vsub.f32 %v705_v57, %v726_v6 }
 0x1ad   :  { %v729_v10 = vsub.f32 %v727_v8, %v728_v9 }
 0x1b0   :  { %v736_v11 = vpop.xlane.xlu0 %735 }
 0x1b1   :  { %v743_v12 = vsel %vm715_vm1, %v736_v11, 0.0  ;;  %v753_v33 = vmul.f32 0.5, %v736_v11 }
 0x1b2   :  { %744 = vadd.xlane.f32.xlu1 %v743_v12 }
 0x1b3   :  { %v754_v37 = vsub.f32 %v733_v59, %v753_v33 }
 0x1b5   :  { %v756_v0 = vsub.f32 %v754_v37, %v755_v40 }
 0x237   :  { %v718_v13 = vpop.xlane.xlu1 %717 }
 0x238   :  { %v719_v14 = vrot.slane %v718_v13, 4 }
 0x23a   :  { %v720_v15 = vadd.f32 %v719_v14, %v718_v13 }
 0x23c   :  { %v721_v16 = vrot.slane %v720_v15, 2 }
 0x23e   :  { %v722_v17 = vadd.f32 %v721_v16, %v720_v15 }
 0x23f   :  { %v745_v18 = vpop.xlane.xlu1 %744 }
 0x240   :  { %v746_v19 = vrot.slane %v745_v18, 4  ;;  %v723_v20 = vrot.slane %v722_v17, 1 }
 0x242   :  { %v747_v21 = vadd.f32 %v746_v19, %v745_v18  ;;  %v724_v22 = vadd.f32 %v723_v20, %v722_v17 }
 0x244   :  { %v748_v23 = vrot.slane %v747_v21, 2  ;;  %855 = vpush %v724_v22 }
 0x246   :  { %v749_v24 = vadd.f32 %v748_v23, %v747_v21 }
 0x248   :  { %v750_v25 = vrot.slane %v749_v24, 1 }
 0x24a   :  { %v751_v26 = vadd.f32 %v750_v25, %v749_v24 }
 0x24c   :  { %857 = vpush %v751_v26 }
 0x275   :  { %s856_s1 = spop %855 }
 0x276   :  { %s730_s4 = smul.f32 0.25, %s856_s1 }
 0x278   :  { %v731_v34 = vstv %s730_s4 }
 0x279   :  { %v732_v35 = vadd.f32 %v731_v34, %v729_v10 }
 0x27b   :  { %v765_v38 = vsel %vm764_vm2, %v732_v35, 0.0 }
 0x27c   :  { %v766_v39 = vsel %vm40_vm0, %v765_v38, 0.0 }
 0x27d   :  { %s858_s5 = spop %857  ;;  %767 = vadd.xlane.f32.xlu0 %v766_v39  ;;  %v776_v41 = vrot.slane %v766_v39, 4 }
 0x27e   :  { %s757_s6 = smul.f32 0.25, %s858_s5 }
 0x27f   :  { %v777_v42 = vadd.f32 %v776_v41, %v766_v39 }
 0x280   :  { %v758_v43 = vstv %s757_s6 }
 0x281   :  { %v759_v44 = vadd.f32 %v758_v43, %v756_v0  ;;  %v778_v45 = vrot.slane %v777_v42, 2 }
 0x283   :  { %v823_v46 = vmul.f32 %v759_v44, %v732_v35  ;;  %v779_v47 = vadd.f32 %v778_v45, %v777_v42  ;;  %v789_v48 = vsel %vm764_vm2, %v759_v44, 0.0 }
 0x284   :  { %v790_v49 = vsel %vm40_vm0, %v789_v48, 0.0 }
 0x285   :  { %v780_v50 = vrot.slane %v779_v47, 1  ;;  %791 = vadd.xlane.f32.xlu1 %v790_v49  ;;  %v800_v51 = vrot.slane %v790_v49, 4 }
 0x287   :  { %v781_v52 = vadd.f32 %v780_v50, %v779_v47  ;;  %v801_v53 = vadd.f32 %v800_v51, %v790_v49 }
 0x289   :  { %870 = vrsqrt.f32 %v781_v52  ;;  %v802_v54 = vrot.slane %v801_v53, 2  ;;  %vm784_vm3 = vcmp.eq.f32.partialorder %v781_v52, inf  ;;  %v787_v3 = vand.u32 2147483648, %v781_v52 }
 0x28a   :  { %vm786_vm4 = vcmp.eq.f32.partialorder %v781_v52, 0.0 }
 0x28b   :  { %v803_v55 = vadd.f32 %v802_v54, %v801_v53 }
 0x28d   :  { %v804_v56 = vrot.slane %v803_v55, 1 }
 0x28f   :  { %v805_v57 = vadd.f32 %v804_v56, %v803_v55 }
 0x291   :  { %872 = vrsqrt.f32 %v805_v57  ;;  %vm808_vm5 = vcmp.eq.f32.partialorder %v805_v57, inf  ;;  %v811_v1 = vand.u32 2147483648, %v805_v57  ;;  %vm810_vm6 = vcmp.eq.f32.partialorder %v805_v57, 0.0 }
 0x293   :  { %v871_v58 = vpop.eup %870 }
 0x294   :  { %v783_v59 = vmul.f32 %v871_v58, %v781_v52 }
 0x296   :  { %v785_v60 = vsel %vm784_vm3, %v781_v52, %v783_v59 }
 0x297   :  { %v788_v63 = vsel %vm786_vm4, %v787_v3, %v785_v60 }
 0x298   :  { %v818_v5 = vadd.f32 1e-06, %v788_v63 }
 0x29b   :  { %v873_v61 = vpop.eup %872 }
 0x29c   :  { %v807_v62 = vmul.f32 %v873_v61, %v805_v57 }
 0x29e   :  { %v809_v2 = vsel %vm808_vm5, %v805_v57, %v807_v62 }
 0x29f   :  { %v812_v4 = vsel %vm810_vm6, %v811_v1, %v809_v2 }
 0x2a0   :  { %v819_v6 = vadd.f32 1e-06, %v812_v4 }
 0x2a2   :  { %v820_v7 = vmul.f32 %v819_v6, %v818_v5 }
 0x30a   :  { %v768_v8 = vpop.xlane.xlu0 %767 }
 0x30b   :  { %874 = vrsqrt.f32 %v768_v8  ;;  %vm771_vm7 = vcmp.eq.f32.partialorder %v768_v8, inf  ;;  %v774_v14 = vand.u32 2147483648, %v768_v8  ;;  %vm773_vm8 = vcmp.eq.f32.partialorder %v768_v8, 0.0 }
 0x312   :  { %v792_v9 = vpop.xlane.xlu1 %791 }
 0x313   :  { %876 = vrsqrt.f32 %v792_v9  ;;  %vm795_vm9 = vcmp.eq.f32.partialorder %v792_v9, inf  ;;  %v798_v16 = vand.u32 2147483648, %v792_v9  ;;  %vm797_vm10 = vcmp.eq.f32.partialorder %v792_v9, 0.0 }
 0x315   :  { %v875_v10 = vpop.eup %874 }
 0x316   :  { %v770_v11 = vmul.f32 %v875_v10, %v768_v8 }
 0x318   :  { %v772_v12 = vsel %vm771_vm7, %v768_v8, %v770_v11 }
 0x319   :  { %v775_v17 = vsel %vm773_vm8, %v774_v14, %v772_v12 }
 0x31a   :  { %v813_v21 = vadd.f32 1e-06, %v775_v17 }
 0x31d   :  { %v877_v13 = vpop.eup %876 }
 0x31e   :  { %v794_v15 = vmul.f32 %v877_v13, %v792_v9 }
 0x320   :  { %v796_v18 = vsel %vm795_vm9, %v792_v9, %v794_v15 }
 0x321   :  { %v799_v19 = vsel %vm797_vm10, %v798_v16, %v796_v18 }
 0x322   :  { %v814_v20 = vadd.f32 1e-06, %v799_v19 }
 0x324   :  { %v815_v22 = vmul.f32 %v814_v20, %v813_v21 }
 0x326   :  { %878 = vrcp.f32 %v815_v22 }
 0x327   :  { %880 = vrcp.f32 %v820_v7 }
 0x330   :  { %v879_v23 = vpop.eup %878 }
 0x331   :  { %v817_v24 = vmul.f32 9.536743e-07, %v879_v23  ;;  %v881_v26 = vpop.eup %880 }
 0x333   :  { %v824_v25 = vmul.f32 %v823_v46, %v817_v24 }
 0x335   :  { %v825_v27 = vmul.f32 %v881_v26, %v824_v25 }
 0x337   :  { %v826_v28 = vsel %vm40_vm0, %v825_v27, 0.0 }
 0x338   :  { %827 = vadd.xlane.f32.xlu0 %v826_v28 }
 0x3c5   :  { %v828_v29 = vpop.xlane.xlu0 %827 }
 0x3c6   :  { %v829_v30 = vrot.slane %v828_v29, 4 }
 0x3c8   :  { %v830_v31 = vadd.f32 %v829_v30, %v828_v29 }
 0x3ca   :  { %v831_v32 = vrot.slane %v830_v31, 2 }
 0x3cc   :  { %v832_v33 = vadd.f32 %v831_v32, %v830_v31 }
 0x3ce   :  { %v833_v34 = vrot.slane %v832_v33, 1 }
 0x3d0   :  { %v834_v35 = vadd.f32 %v833_v34, %v832_v33 }
 0x3d2   :  { %859 = vpush %v834_v35 }
 0x403   :  { %s860_s9 = spop %859 }
 0x404   :  { %v836_v36 = vstv %s860_s9 }
 0x405   :  { %838 = vst.msk [vmem:[#allocation9] sm:$0x1] %vm837_vm11, %v836_v36 }
 0x406   :  { %937 = shalt.err (!%p934_p6)
}
 0x407   :  { %s938_s14 = scalar_lea.hbm %s1031_s2, 16 }
 0x408   :  { %p939_p7 = scmp.ne.s32.totalorder %s1031_s2, %s938_s14  ;;  %p942_p8 = scmp.lt.u32.totalorder %s938_s14, %s1031_s2 }
 0x40a   :  { %p944_p9 = pnand %p942_p8, %p939_p7 }
 0x40c   :  { %947 = shalt.err (!%p944_p9)
}
 0x40d   :  { %848 = dma.vmem_to_hbm [thread:$0]  %s846_s8, 16, %s1031_s2, [#allocation6]  }
 0x40e   :  { %952 = dma.done.wait [#allocation6], 16  }
 0x40f   :  { %953 = vsyncadd [#allocation6], 4294967280 }
 0x410   :  { %852 = vsyncpa [#allocation5], 1 }
 0x411   :  { %853 = vsyncpa [#allocation8], 1 }
 0x412   :  { %854 = vsyncpa [#allocation6], 1 }

</bundles_post_ra>
